<compile_context>
chip_gen: v7x
topology: tpu7x:2x2x1
jax: 0.10.0
libtpu: 0.0.40
codegen_flags: <defaults>
</compile_context>

<pallas_src>
import jax
import jax.numpy as jnp
from jax.experimental import pallas as pl
from jax.experimental.pallas import tpu as pltpu

_LANES = 128
_SUBLANES = 8
_ROW = _LANES * _SUBLANES            # 1024: lane-dense flatten width (multiple of 128)
_IN_BLOCK_BYTES = 2 * 1024 * 1024    # per-step input tile budget
_OUT_BLOCK_BYTES = 4 * 1024 * 1024   # per-step output tile budget (double-buffered by Pallas)


def _stack_kernel(x_ref, o_ref):
    # x_ref: (Mt, L); o_ref: (Tb, Mt, L) -> write Tb replicas with one broadcast store.
    o_ref[...] = jnp.broadcast_to(x_ref[...], o_ref.shape)


def direc_encoder(x: jax.Array, T: int) -> jax.Array:
    """Replicates x T times along a new leading axis (torch.stack([x]*T, dim=0))."""
    orig_shape = x.shape
    total = x.size
    elem = jnp.dtype(x.dtype).itemsize

    # --- wrapper-side layout: flatten to a lane-dense (M, L) slab, L = 1024 ---
    pad = (-total) % _ROW
    x_flat = x.reshape(-1)
    if pad:
        x_flat = jnp.pad(x_flat, (0, pad))
    padded = total + pad
    L = _ROW
    M = padded // L
    x2d = x_flat.reshape(M, L)

    # --- tile sizing: keep (in + 2 * out) far below scoped VMEM, v7x-safe ---
    row_bytes = L * elem
    mt = max(1, _IN_BLOCK_BYTES // row_bytes)
    mt = (mt // _SUBLANES) * _SUBLANES or _SUBLANES   # multiple of 8 for (8,128) tiling
    if mt >= M:
        mt = M                                        # full dim -> no divisibility constraint
    tb = max(1, _OUT_BLOCK_BYTES // (mt * row_bytes))
    tb = min(tb, T)

    # m OUTER, t INNER: input block index is constant across inner t steps,
    # so Pallas skips the redundant input DMAs (x read once per m chunk).
    grid = (pl.cdiv(M, mt), pl.cdiv(T, tb))

    out2d = pl.pallas_call(
        _stack_kernel,
        out_shape=jax.ShapeDtypeStruct((T, M, L), x.dtype),
        grid=grid,
        in_specs=[
            pl.BlockSpec((mt, L), lambda m, t: (m, 0)),      # depends only on m
        ],
        out_specs=pl.BlockSpec((tb, mt, L), lambda m, t: (t, m, 0)),
        compiler_params=pltpu.CompilerParams(
            dimension_semantics=("parallel", "parallel"),
            vmem_limit_bytes=32 * 1024 * 1024,
        ),
        cost_estimate=pl.CostEstimate(
            flops=0,
            transcendentals=0,
            bytes_accessed=(T + 1) * padded * elem,
        ),
    )(x2d)

    # Undo the wrapper-side layout change (pure reshapes / slice, no extra copies of note).
    out = out2d.reshape(T, padded)
    if pad:
        out = out[:, :total]
    return out.reshape((T,) + orig_shape)


if __name__ == "__main__":
    key = jax.random.PRNGKey(0)
    N, C, H, W = 2, 4, 16, 16
    T = 5

    x = jax.random.normal(key, (N, C, H, W), dtype=jnp.float32)

    out = direc_encoder(x, T)
    out = jax.block_until_ready(out)

    # Reference: plain JAX equivalent of torch.stack([x] * T, dim=0)
    ref = jnp.stack([x] * T, axis=0)

    assert out.shape == (T, N, C, H, W), out.shape
    assert out.dtype == x.dtype, out.dtype
    assert jnp.array_equal(out, ref), "mismatch vs. reference stack"

    print("KERNEL_OK")
</pallas_src>

<mosaic_0001>
module attributes {stable_mosaic.version = 11 : i64} {
  func.func @_stack_kernel(%arg0: i32, %arg1: i32, %arg2: memref<2x1024xf32, #tpu.memory_space<vmem>>, %arg3: memref<5x2x1024xf32, #tpu.memory_space<vmem>>) attributes {dimension_semantics = [#tpu.dimension_semantics<parallel>, #tpu.dimension_semantics<parallel>], iteration_bounds = array<i64: 1, 1>, scalar_prefetch = 0 : i64, scratch_operands = 0 : i64, tpu.core_type = #tpu.core_type<tc>, window_params = [{transform_indices = @transform_0, window_bounds = array<i64: 2, 1024>}, {transform_indices = @transform_1, window_bounds = array<i64: 5, 2, 1024>}]} {
    %c0 = arith.constant 0 : index
    %c0_0 = arith.constant 0 : index
    %0 = vector.load %arg2[%c0, %c0_0] : memref<2x1024xf32, #tpu.memory_space<vmem>>, vector<2x1024xf32>
    %1 = vector.shape_cast %0 : vector<2x1024xf32> to vector<1x2x1024xf32>
    %2 = vector.broadcast %1 : vector<1x2x1024xf32> to vector<5x2x1024xf32>
    %c0_1 = arith.constant 0 : index
    %c0_2 = arith.constant 0 : index
    %c0_3 = arith.constant 0 : index
    %3 = vector.load %arg3[%c0_1, %c0_2, %c0_3] : memref<5x2x1024xf32, #tpu.memory_space<vmem>>, vector<5x2x1024xf32>
    tpu.vector_store %arg3[%c0_1, %c0_2, %c0_3], %2 {strides = array<i32>} : memref<5x2x1024xf32, #tpu.memory_space<vmem>>, vector<5x2x1024xf32>,
    return
  }
  func.func @transform_0(%arg0: i32, %arg1: i32) -> (i32, i32) {
    %c0_i32 = arith.constant 0 : i32
    %c0_i32_0 = arith.constant 0 : i32
    return %arg0, %c0_i32 : i32, i32
  }
  func.func @transform_1(%arg0: i32, %arg1: i32) -> (i32, i32, i32) {
    %c0_i32 = arith.constant 0 : i32
    %c0_i32_0 = arith.constant 0 : i32
    return %arg1, %arg0, %c0_i32 : i32, i32, i32
  }
}

</mosaic_0001>

<bundles_post_ra>
// kernel: tpu_custom_call.1
= control target key start
LH: loop header
LB: loop body
LE: loop exit
PB: predicated region body
PF: predicated region fallthrough
CT: control target
= control target key end

     0   :  { %6 = vsyncpa [#allocation3], 0  ;;  %s147_s0 = inlined_call_operand.hbm [shape: f32[2,1024], index: 0, kind: input, shape index: {}]   ;;  %s148_s1 = inlined_call_operand.hbm [shape: f32[5,2,1024], index: 1, kind: output, shape index: {}]  }
   0x1   :  { %7 = vsyncpa [#allocation4], 0  ;;  %s102_s6 = smov [#allocation2]   ;;  %s54_s10 = scalar_lea.hbm %s147_s0, 256 }
   0x2   :  { %s14_s7 = sshll.u32 %s102_s6, 4  ;;  %p55_p0 = scmp.ne.s32.totalorder %s147_s0, %s54_s10  ;;  %s15_s7 = int_to_ptr.vmem [resolvable:$true] %s14_s7 }
   0x3   :  { %p58_p1 = scmp.lt.u32.totalorder %s54_s10, %s147_s0 }
   0x5   :  { %p60_p2 = pnand %p58_p1, %p55_p0 }
   0x7   :  { %63 = shalt.err (!%p60_p2)
}
   0x8   :  { %s64_s15 = scalar_lea.vmem %s15_s7, 256  ;;  %p69_p4 = scmp.lt.s32.totalorder %s15_s7, %s15_s7 }
   0x9   :  { %p65_p3 = scmp.ne.s32.totalorder %s15_s7, %s64_s15  ;;  %p70_p5 = scmp.lt.s32.totalorder %s64_s15, %s64_s15 }
   0xb   :  { %p71_p6 = por %p70_p5, %p69_p4 }
   0xd   :  { %p72_p7 = pnand %p71_p6, %p65_p3 }
   0xf   :  { %75 = shalt.err (!%p72_p7)
}
  0x10   :  { %17 = dma.hbm_to_vmem [thread:$0]  %s147_s0, 256, %s15_s7, [#allocation3]  }
  0x11   :  { %98 = dma.done.wait [#allocation3], 256  }
  0x12   :  { %99 = vsyncadd [#allocation3], 4294967040  ;;  %s103_s18 = smov [#allocation5]   ;;  %v21_v0 = vld [vmem:[#allocation2] sm:$0xff]  ;;  %v22_v1 = vld [vmem:[#allocation2 + $0x8] sm:$0xff] }
  0x13   :  { %s38_s19 = sshll.u32 %s103_s18, 4  ;;  %23 = vst [vmem:[#allocation5] sm:$0xff] %v21_v0  ;;  %25 = vst [vmem:[#allocation5 + $0x10] sm:$0xff] %v21_v0  ;;  %s128_s19 = int_to_ptr.vmem [resolvable:$true] %s38_s19 }
  0x14   :  { %27 = vst [vmem:[#allocation5 + $0x20] sm:$0xff] %v21_v0  ;;  %29 = vst [vmem:[#allocation5 + $0x30] sm:$0xff] %v21_v0  ;;  %s76_s0 = scalar_lea.vmem %s128_s19, 1280  ;;  %p81_p9 = scmp.lt.s32.totalorder %s128_s19, %s128_s19 }
  0x15   :  { %31 = vst [vmem:[#allocation5 + $0x40] sm:$0xff] %v21_v0  ;;  %24 = vst [vmem:[#allocation5 + $0x8] sm:$0xff] %v22_v1  ;;  %p77_p8 = scmp.ne.s32.totalorder %s128_s19, %s76_s0  ;;  %p82_p10 = scmp.lt.s32.totalorder %s76_s0, %s76_s0 }
  0x16   :  { %26 = vst [vmem:[#allocation5 + $0x18] sm:$0xff] %v22_v1  ;;  %28 = vst [vmem:[#allocation5 + $0x28] sm:$0xff] %v22_v1 }
  0x17   :  { %30 = vst [vmem:[#allocation5 + $0x38] sm:$0xff] %v22_v1  ;;  %32 = vst [vmem:[#allocation5 + $0x48] sm:$0xff] %v22_v1  ;;  %p83_p11 = por %p82_p10, %p81_p9 }
  0x19   :  { %p84_p12 = pnand %p83_p11, %p77_p8 }
  0x1b   :  { %87 = shalt.err (!%p84_p12)
}
  0x1c   :  { %s88_s22 = scalar_lea.hbm %s148_s1, 1280 }
  0x1d   :  { %p89_p13 = scmp.ne.s32.totalorder %s148_s1, %s88_s22  ;;  %p92_p0 = scmp.lt.u32.totalorder %s88_s22, %s148_s1 }
  0x1f   :  { %p94_p1 = pnand %p92_p0, %p89_p13 }
  0x21   :  { %97 = shalt.err (!%p94_p1)
}
  0x22   :  { %s104_s27 = smov 256   ;;  %s105_s28 = smov 16  }
  0x23   :  { %44 = dma.vmem_to_hbm [thread:$0]  %s128_s19, 1280, %s148_s1, [#allocation4], %s104_s27, %s104_s27, %s105_s28  }
  0x24   :  { %100 = dma.done.wait [#allocation4], 1280  }
  0x25   :  { %101 = vsyncadd [#allocation4], 4294966016 }
  0x26   :  { %48 = vsyncpa [#allocation3], 1 }
  0x27   :  { %49 = vsyncpa [#allocation4], 1 }

</bundles_post_ra>
